<compile_context>
chip_gen: v6e
topology: v6e:2x2x1
jax: 0.10.0
libtpu: 0.0.40
codegen_flags: <defaults>
</compile_context>

<pallas_src>
import functools

import jax
import jax.numpy as jnp
from jax.experimental import pallas as pl
from jax.experimental.pallas import tpu as pltpu


def _round_up(a, m):
    return ((a + m - 1) // m) * m


def _seg_mean_kernel(ptr_ref, starts_ref, ends_ref, inv_ref, x_ref, o_ref,
                     acc_ref, *, tg, tn):
    """Grid = (segment groups, row tiles).  acc[TG, Dp] += W[TG, TN] @ x[TN, Dp]."""
    g = pl.program_id(0)           # segment-group index ("parallel")
    r = pl.program_id(1)           # row-tile index (reduction axis, "arbitrary")
    nr = pl.num_programs(1)

    @pl.when(r == 0)
    def _init():
        acc_ref[...] = jnp.zeros_like(acc_ref)

    tile_lo = r * tn
    tile_hi = tile_lo + tn
    # Group row-range from scalar-prefetched ptr in SMEM (ptr is sorted).
    grp_lo = ptr_ref[g * tg]
    grp_hi = ptr_ref[(g + 1) * tg]

    @pl.when(jnp.logical_and(tile_lo < grp_hi, tile_hi > grp_lo))
    def _accumulate():
        x = x_ref[...]                               # (TN, Dp)
        starts = starts_ref[...]                     # (TG, 1) int32
        ends = ends_ref[...]                         # (TG, 1) int32
        inv = inv_ref[...]                           # (TG, 1) f32, 1/max(cnt,1)
        # Global row id for every (segment, row-in-tile) pair.
        row_ids = tile_lo + jax.lax.broadcasted_iota(jnp.int32, (tg, tn), 1)
        in_seg = (row_ids >= starts) & (row_ids < ends)          # (TG, TN)
        w = jnp.where(in_seg, inv, jnp.zeros_like(inv))          # (TG, TN) f32
        # MXU contraction over the row-tile; 1/count folded into W, f32 accum.
        acc_ref[...] += jnp.dot(w, x.astype(jnp.float32),
                                preferred_element_type=jnp.float32)

    @pl.when(r == nr - 1)
    def _finalize():
        o_ref[...] = acc_ref[...].astype(o_ref.dtype)


def avg_pooling(x, ptr, *, tg=8, tn=512):
    """x: [N, D], ptr: [G+1] int32 (sorted, ptr[0]=0, ptr[-1]<=N) -> [G, D] means.

    Empty segments (ptr[i] == ptr[i+1]) return 0 rather than NaN.
    """
    n, d = x.shape
    g = int(ptr.shape[0]) - 1
    ptr = ptr.astype(jnp.int32)

    # Tile / padding choices: lane-dense D (multiple of 128), sublane-dense
    # segment groups (TG rows of output per step), row tiles of TN (<= 512).
    tn = min(tn, _round_up(max(n, 8), 8))
    n_pad = _round_up(n, tn)
    d_pad = _round_up(max(d, 128), 128)
    g_pad = _round_up(max(g, tg), tg)

    x_p = jnp.pad(x, ((0, n_pad - n), (0, d_pad - d)))

    # Pad ptr with copies of its last boundary -> padded segments are empty.
    last = ptr[g]
    ptr_p = jnp.concatenate(
        [ptr, jnp.full((g_pad - g,), last, dtype=jnp.int32)])       # (g_pad+1,)

    starts = ptr_p[:-1]
    ends = ptr_p[1:]
    cnt = ends - starts
    inv = 1.0 / jnp.maximum(cnt, 1).astype(jnp.float32)             # 0-safe
    starts2 = starts.reshape(g_pad, 1)
    ends2 = ends.reshape(g_pad, 1)
    inv2 = inv.reshape(g_pad, 1)

    grid = (g_pad // tg, n_pad // tn)

    out = pl.pallas_call(
        functools.partial(_seg_mean_kernel, tg=tg, tn=tn),
        out_shape=jax.ShapeDtypeStruct((g_pad, d_pad), x.dtype),
        grid_spec=pltpu.PrefetchScalarGridSpec(
            num_scalar_prefetch=1,                  # ptr -> SMEM (tile skipping)
            grid=grid,
            in_specs=[
                pl.BlockSpec((tg, 1), lambda gi, ri, p: (gi, 0)),       # starts
                pl.BlockSpec((tg, 1), lambda gi, ri, p: (gi, 0)),       # ends
                pl.BlockSpec((tg, 1), lambda gi, ri, p: (gi, 0)),       # 1/count
                pl.BlockSpec((tn, d_pad), lambda gi, ri, p: (ri, 0)),   # x row tile
            ],
            out_specs=pl.BlockSpec((tg, d_pad), lambda gi, ri, p: (gi, 0)),
            scratch_shapes=[pltpu.VMEM((tg, d_pad), jnp.float32)],
        ),
        compiler_params=pltpu.CompilerParams(
            dimension_semantics=("parallel", "arbitrary")),
    )(ptr_p, starts2, ends2, inv2, x_p)

    return out[:g, :d]


if __name__ == "__main__":
    key = jax.random.PRNGKey(0)

    # Small, module-consistent shapes: N=16 rows of D=32 features, G=3 segments.
    N, D = 16, 32
    x = jax.random.normal(key, (N, D), dtype=jnp.float32)
    ptr = jnp.array([0, 5, 12, 16], dtype=jnp.int32)   # segment lengths 5, 7, 4

    out = jax.block_until_ready(avg_pooling(x, ptr))

    # Pure-JAX reference (mirrors the PyTorch loop exactly).
    ref = jnp.concatenate(
        [x[int(ptr[i]):int(ptr[i + 1])].mean(axis=0, keepdims=True)
         for i in range(ptr.shape[0] - 1)],
        axis=0,
    )
    assert out.shape == ref.shape == (ptr.shape[0] - 1, D)
    assert jnp.allclose(out, ref, atol=1e-5, rtol=1e-5), "mismatch vs reference"

    print("KERNEL_OK")
</pallas_src>

<mosaic_0001>
module attributes {stable_mosaic.version = 11 : i64} {
  func.func @_seg_mean_kernel(%arg0: i32, %arg1: i32, %arg2: memref<9xi32, #tpu.memory_space<smem>>, %arg3: memref<8x1xi32, #tpu.memory_space<vmem>>, %arg4: memref<8x1xi32, #tpu.memory_space<vmem>>, %arg5: memref<8x1xf32, #tpu.memory_space<vmem>>, %arg6: memref<16x128xf32, #tpu.memory_space<vmem>>, %arg7: memref<8x128xf32, #tpu.memory_space<vmem>>, %arg8: memref<8x128xf32, #tpu.memory_space<vmem>>) attributes {dimension_semantics = [#tpu.dimension_semantics<parallel>, #tpu.dimension_semantics<arbitrary>], iteration_bounds = array<i64: 1, 1>, scalar_prefetch = 1 : i64, scratch_operands = 1 : i64, tpu.core_type = #tpu.core_type<tc>, window_params = [{transform_indices = @transform_0, window_bounds = array<i64: 8, 1>}, {transform_indices = @transform_1, window_bounds = array<i64: 8, 1>}, {transform_indices = @transform_2, window_bounds = array<i64: 8, 1>}, {transform_indices = @transform_3, window_bounds = array<i64: 16, 128>}, {transform_indices = @transform_4, window_bounds = array<i64: 8, 128>}]} {
    %c0_i32 = arith.constant 0 : i32
    %0 = arith.cmpi eq, %arg1, %c0_i32 : i32
    %1 = arith.extui %0 : i1 to i32
    %c0_i32_0 = arith.constant 0 : i32
    %2 = arith.cmpi ne, %1, %c0_i32_0 : i32
    scf.if %2 {
      %cst = arith.constant 0.000000e+00 : f32
      %20 = vector.broadcast %cst : f32 to vector<8x128xf32>
      %c0 = arith.constant 0 : index
      %c0_6 = arith.constant 0 : index
      %21 = vector.load %arg8[%c0, %c0_6] : memref<8x128xf32, #tpu.memory_space<vmem>>, vector<8x128xf32>
      tpu.vector_store %arg8[%c0, %c0_6], %20 {strides = array<i32>} : memref<8x128xf32, #tpu.memory_space<vmem>>, vector<8x128xf32>,
    } else {
    }
    %c16_i32 = arith.constant 16 : i32
    %3 = arith.muli %arg1, %c16_i32 : i32
    %c16_i32_1 = arith.constant 16 : i32
    %4 = arith.addi %3, %c16_i32_1 : i32
    %c8_i32 = arith.constant 8 : i32
    %5 = arith.muli %arg0, %c8_i32 : i32
    %6 = arith.index_cast %5 : i32 to index
    %7 = memref.load %arg2[%6] : memref<9xi32, #tpu.memory_space<smem>>
    %c1_i32 = arith.constant 1 : i32
    %8 = arith.addi %arg0, %c1_i32 : i32
    %c8_i32_2 = arith.constant 8 : i32
    %9 = arith.muli %8, %c8_i32_2 : i32
    %10 = arith.index_cast %9 : i32 to index
    %11 = memref.load %arg2[%10] : memref<9xi32, #tpu.memory_space<smem>>
    %12 = arith.cmpi slt, %3, %11 : i32
    %13 = arith.cmpi sgt, %4, %7 : i32
    %14 = arith.andi %12, %13 : i1
    %15 = arith.extui %14 : i1 to i32
    %c0_i32_3 = arith.constant 0 : i32
    %16 = arith.cmpi ne, %15, %c0_i32_3 : i32
    scf.if %16 {
      %c0 = arith.constant 0 : index
      %c0_6 = arith.constant 0 : index
      %20 = vector.load %arg6[%c0, %c0_6] : memref<16x128xf32, #tpu.memory_space<vmem>>, vector<16x128xf32>
      %c0_7 = arith.constant 0 : index
      %c0_8 = arith.constant 0 : index
      %21 = vector.load %arg3[%c0_7, %c0_8] : memref<8x1xi32, #tpu.memory_space<vmem>>, vector<8x1xi32>
      %c0_9 = arith.constant 0 : index
      %c0_10 = arith.constant 0 : index
      %22 = vector.load %arg4[%c0_9, %c0_10] : memref<8x1xi32, #tpu.memory_space<vmem>>, vector<8x1xi32>
      %c0_11 = arith.constant 0 : index
      %c0_12 = arith.constant 0 : index
      %23 = vector.load %arg5[%c0_11, %c0_12] : memref<8x1xf32, #tpu.memory_space<vmem>>, vector<8x1xf32>
      %24 = tpu.iota {dimensions = array<i32: 1>} : vector<8x16xi32>
      %25 = vector.broadcast %3 : i32 to vector<8x16xi32>
      %26 = arith.addi %25, %24 : vector<8x16xi32>
      %27 = vector.broadcast %21 : vector<8x1xi32> to vector<8x16xi32>
      %28 = arith.cmpi sge, %26, %27 : vector<8x16xi32>
      %29 = vector.broadcast %22 : vector<8x1xi32> to vector<8x16xi32>
      %30 = arith.cmpi slt, %26, %29 : vector<8x16xi32>
      %31 = arith.andi %28, %30 : vector<8x16xi1>
      %cst = arith.constant 0.000000e+00 : f32
      %32 = vector.broadcast %cst : f32 to vector<8x1xf32>
      %33 = vector.shape_cast %23 : vector<8x1xf32> to vector<8x1xf32>
      %34 = vector.broadcast %33 : vector<8x1xf32> to vector<8x16xf32>
      %35 = vector.shape_cast %32 : vector<8x1xf32> to vector<8x1xf32>
      %36 = vector.broadcast %35 : vector<8x1xf32> to vector<8x16xf32>
      %37 = arith.select %31, %34, %36 : vector<8x16xi1>, vector<8x16xf32>
      %c0_13 = arith.constant 0 : index
      %c0_14 = arith.constant 0 : index
      %38 = vector.load %arg8[%c0_13, %c0_14] : memref<8x128xf32, #tpu.memory_space<vmem>>, vector<8x128xf32>
      %cst_15 = arith.constant dense<0.000000e+00> : vector<8x128xf32>
      %39 = tpu.matmul %37, %20, %cst_15 {dimension_numbers = #tpu.dot_dimension_numbers<[1], [0], [0], [1], [0, 0, 1, 1], [], []>} : vector<8x16xf32>, vector<16x128xf32>, vector<8x128xf32> -> vector<8x128xf32>
      %40 = arith.addf %38, %39 : vector<8x128xf32>
      %c0_16 = arith.constant 0 : index
      %c0_17 = arith.constant 0 : index
      %41 = vector.load %arg8[%c0_16, %c0_17] : memref<8x128xf32, #tpu.memory_space<vmem>>, vector<8x128xf32>
      tpu.vector_store %arg8[%c0_16, %c0_17], %40 {strides = array<i32>} : memref<8x128xf32, #tpu.memory_space<vmem>>, vector<8x128xf32>,
    } else {
    }
    %c0_i32_4 = arith.constant 0 : i32
    %17 = arith.cmpi eq, %arg1, %c0_i32_4 : i32
    %18 = arith.extui %17 : i1 to i32
    %c0_i32_5 = arith.constant 0 : i32
    %19 = arith.cmpi ne, %18, %c0_i32_5 : i32
    scf.if %19 {
      %c0 = arith.constant 0 : index
      %c0_6 = arith.constant 0 : index
      %20 = vector.load %arg8[%c0, %c0_6] : memref<8x128xf32, #tpu.memory_space<vmem>>, vector<8x128xf32>
      %c0_7 = arith.constant 0 : index
      %c0_8 = arith.constant 0 : index
      %21 = vector.load %arg7[%c0_7, %c0_8] : memref<8x128xf32, #tpu.memory_space<vmem>>, vector<8x128xf32>
      tpu.vector_store %arg7[%c0_7, %c0_8], %20 {strides = array<i32>} : memref<8x128xf32, #tpu.memory_space<vmem>>, vector<8x128xf32>,
    } else {
    }
    return
  }
  func.func @transform_0(%arg0: i32, %arg1: i32, %arg2: memref<9xi32, #tpu.memory_space<smem>>) -> (i32, i32) {
    %c0_i32 = arith.constant 0 : i32
    %c0_i32_0 = arith.constant 0 : i32
    return %arg0, %c0_i32 : i32, i32
  }
  func.func @transform_1(%arg0: i32, %arg1: i32, %arg2: memref<9xi32, #tpu.memory_space<smem>>) -> (i32, i32) {
    %c0_i32 = arith.constant 0 : i32
    %c0_i32_0 = arith.constant 0 : i32
    return %arg0, %c0_i32 : i32, i32
  }
  func.func @transform_2(%arg0: i32, %arg1: i32, %arg2: memref<9xi32, #tpu.memory_space<smem>>) -> (i32, i32) {
    %c0_i32 = arith.constant 0 : i32
    %c0_i32_0 = arith.constant 0 : i32
    return %arg0, %c0_i32 : i32, i32
  }
  func.func @transform_3(%arg0: i32, %arg1: i32, %arg2: memref<9xi32, #tpu.memory_space<smem>>) -> (i32, i32) {
    %c0_i32 = arith.constant 0 : i32
    %c0_i32_0 = arith.constant 0 : i32
    return %arg1, %c0_i32 : i32, i32
  }
  func.func @transform_4(%arg0: i32, %arg1: i32, %arg2: memref<9xi32, #tpu.memory_space<smem>>) -> (i32, i32) {
    %c0_i32 = arith.constant 0 : i32
    %c0_i32_0 = arith.constant 0 : i32
    return %arg0, %c0_i32 : i32, i32
  }
}

</mosaic_0001>

<bundles_post_ra>
// kernel: tpu_custom_call.1
= control target key start
LH: loop header
LB: loop body
LE: loop exit
PB: predicated region body
PF: predicated region fallthrough
CT: control target
= control target key end

     0   :  { %s278_s0 = inlined_call_operand.vmem [shape: s32[9], index: 0, kind: input, shape index: {}]   ;;  %s279_s1 = inlined_call_operand.vmem [shape: s32[8,1], index: 1, kind: input, shape index: {}]   ;;  %s280_s2 = inlined_call_operand.vmem [shape: s32[8,1], index: 2, kind: input, shape index: {}]   ;;  %s281_s3 = inlined_call_operand.vmem [shape: f32[8,1], index: 3, kind: input, shape index: {}]   ;;  %s282_s4 = inlined_call_operand.vmem [shape: f32[16,128], index: 4, kind: input, shape index: {}]   ;;  %s283_s5 = inlined_call_operand.hbm [shape: f32[8,128], index: 5, kind: output, shape index: {}]  }
   0x1   :  { %s10_s20 = sshll.u32 %s278_s0, 4  ;;  %s11_s20 = int_to_ptr.vmem [resolvable:$true] %s10_s20 }
   0x2   :  { %s185_s21 = scalar_lea.vmem %s11_s20, 16  ;;  %p190_p1 = scmp.lt.s32.totalorder %s11_s20, %s11_s20 }
   0x3   :  { %p186_p0 = scmp.ne.s32.totalorder %s11_s20, %s185_s21  ;;  %p191_p2 = scmp.lt.s32.totalorder %s185_s21, %s185_s21 }
   0x5   :  { %p192_p3 = por %p191_p2, %p190_p1 }
   0x7   :  { %p193_p4 = pnand %p192_p3, %p186_p0 }
   0x9   :  { %196 = shalt.err (!%p193_p4)  }
   0xa   :  { %s221_s22 = smov [#allocation4]  }
   0xb   :  { %13 = dma.vmem_to_smem %s11_s20, 16, %s221_s22, [#allocation3] }
   0xc   :  { %217 = dma.done.wait [#allocation3], 16 }
   0xd   :  { %218 = vsyncadd [#allocation3], 4294967280 }
   0xe   :  { %15 = sfence }
   0xf   :  { %16 = vsyncpa [#allocation6], 0  ;;  %s33_s23 = sld [smem:[#allocation4]]  ;;  %v222_v0 = vmov 0.0  }
  0x10   :  { %29 = vst [vmem:[#allocation2] sm:$0xff] %v222_v0  ;;  %s163_s24 = sld [smem:[#allocation4 + $0x8]] }
  0x15   :  { %p165_p5 = scmp.lt.s32.totalorder %s33_s23, 16 }
  0x16   :  { %p164_p6 = scmp.gt.s32.totalorder %s163_s24, 0 }
  0x18   :  { %p39_p7 = pnand %p165_p5, %p164_p6 }
  0x1a   :  { %42 = sbr.rel (%p39_p7) target bundleno = 360 (0x168), region = 25 }
  0x1f   :  { %v45_v1 = vld [vmem:[%s279_s1] sm:$0xff]  ;;  %v223_v3 = vmov 0   ;;  %v44_v4 = vld [vmem:[%s282_s4 + $0x8] sm:$0xff]  ;;  %v224_v6 = vmov 0.0   ;;  %vm225_vm0 = vmmov 0   ;;  %v48_v8 = vlaneseq }
  0x20   :  { %v47_v2 = vld [vmem:[%s281_s3] sm:$0xff]  ;;  %183 = vset.pattern.permute.xlu0 %v223_v3  ;;  %184 = vset.pattern.permute.xlu1 %v223_v3  ;;  %vm68_vm3 = vcmask 130048  }
  0x21   :  { %53 = vperm.xlu0 %183, %v45_v1   ;;  %63 = vperm.xlu1 %184, %v47_v2   ;;  %v46_v5 = vld [vmem:[%s280_s2] sm:$0xff]  ;;  %v49_v10 = vand.u32 127, %v48_v8 }
  0x22   :  { %170 = vmatprep.subr.mxu0 %v224_v6  ;;  %v43_v7 = vld [vmem:[%s282_s4] sm:$0xff]  ;;  %174 = vmatprep.mubr.msk.f32.mxu0 %vm225_vm0, %v224_v6 }
  0x23   :  { %171 = vmatpush3.msra.mxu0 %v44_v4  ;;  %v67_v14 = vld [vmem:[#allocation2] sm:$0xff] }
  0x24   :  { %172 = vmatprep.subr.mxu0 %v224_v6 }
  0x25   :  { %57 = vperm.xlu0 %183, %v46_v5   ;;  %173 = vmatpush3.msra.mxu0 %v43_v7 }
  0x9c   :  { %v54_v9 = vpop.permute.xlu0 %53  ;;  %v64_v12 = vpop.permute.xlu1 %63 }
  0x9d   :  { %vm55_vm1 = vcmp.ge.s32.totalorder %v49_v10, %v54_v9 }
  0xa0   :  { %v58_v11 = vpop.permute.xlu0 %57 }
  0xa1   :  { %vm59_vm2 = vcmp.lt.s32.totalorder %v49_v10, %v58_v11 }
  0xa2   :  { %vm60_vm4 = vmand %vm55_vm1, %vm59_vm2 }
  0xa3   :  { %v66_v13 = vsel %vm60_vm4, %v64_v12, 0.0 }
  0xa4   :  { %175 = vmatmul.mubr.msk.f32.vlgmr.msra.gmra.mxu0 %vm68_vm3, %v66_v13 }
 0x164   :  { %v138_v15 = vpop.f32.mrf.mxu0 }
 0x165   :  { %v142_v16 = vadd.f32 %v138_v15, %v67_v14 }
 0x166   :  { %v176_v17 = vpop.f32.mrf.mxu0 }
 0x167   :  { %143 = vst [vmem:[#allocation2] sm:$0xff] %v142_v16 }
 0x168 PF:  { %s226_s2 = smov [#allocation5]  }
 0x169   :  { %s155_s3 = sshll.u32 %s226_s2, 4  ;;  %s156_s3 = int_to_ptr.vmem [resolvable:$true] %s155_s3 }
 0x16a   :  { %s197_s4 = scalar_lea.vmem %s156_s3, 128  ;;  %p202_p9 = scmp.lt.s32.totalorder %s156_s3, %s156_s3 }
 0x16b   :  { %p198_p8 = scmp.ne.s32.totalorder %s156_s3, %s197_s4  ;;  %p203_p10 = scmp.lt.s32.totalorder %s197_s4, %s197_s4 }
 0x16d   :  { %p204_p11 = por %p203_p10, %p202_p9 }
 0x16e   :  { %v147_v18 = vld [vmem:[#allocation2] sm:$0xff] }
 0x16f   :  { %148 = vst [vmem:[#allocation5] sm:$0xff] %v147_v18  ;;  %p205_p12 = pnand %p204_p11, %p198_p8 }
 0x171   :  { %208 = shalt.err (!%p205_p12)
}
 0x172   :  { %158 = dma.vmem_to_hbm [thread:$0]  %s156_s3, 128, %s283_s5, [#allocation6]  }
 0x173   :  { %219 = dma.done.wait [#allocation6], 128  }
 0x174   :  { %220 = vsyncadd [#allocation6], 4294967168 }
 0x175   :  { %162 = vsyncpa [#allocation6], 1 }

</bundles_post_ra>
